<compile_context>
chip_gen: v7x
topology: tpu7x:2x2x1
jax: 0.10.0
libtpu: 0.0.40
codegen_flags: <defaults>
</compile_context>

<pallas_src>
import functools

import jax
import jax.numpy as jnp
from jax.experimental import pallas as pl
from jax.experimental.pallas import tpu as pltpu

LANES = 128            # vreg lane width
SUBLANES = 8           # vreg sublane height
ROW_ALIGN = 32         # keep rows/block_rows multiples of 32 -> legal tiles for f32/bf16/int8
MAX_BLOCK_ROWS = 8192  # 8192x128 f32 = 4 MiB per input per pipeline buffer


def _round_up(x, m):
    return (x + m - 1) // m * m


def _dice_sums_kernel(p_ref, t_ref, inter_ref, total_ref, *,
                      n_valid, block_rows, blocks_per_shard, num_blocks):
    """Accumulates vreg-shaped (8,128) partial sums of p*t and p+t, p = sigmoid(preds)."""
    c = pl.program_id(0)   # shard axis ("parallel" -> both TCs on v7x)
    i = pl.program_id(1)   # reduction axis ("arbitrary"), accumulators stay resident

    @pl.when(i == 0)
    def _():
        inter_ref[...] = jnp.zeros_like(inter_ref)
        total_ref[...] = jnp.zeros_like(total_ref)

    blk = c * blocks_per_shard + i                 # logical block index (traced)
    block_elems = block_rows * LANES
    full_blocks = n_valid // block_elems           # static: blocks entirely valid
    full_valid_rows = n_valid // LANES             # static
    rem_lanes = n_valid % LANES                    # static

    def sigmoid(x):
        # One EUP transcendental per element (exp + divide would be two).
        return 0.5 * jnp.tanh(0.5 * x) + 0.5

    def accumulate(p, t):
        # Sublane-aligned partial reduce: pure vreg adds on the VPU, no per-step XLU
        # reduce; the final (8,128)->scalar reduction happens once in the wrapper.
        inter_ref[...] += (p * t).reshape(-1, SUBLANES, LANES).sum(axis=0)[None]
        total_ref[...] += (p + t).reshape(-1, SUBLANES, LANES).sum(axis=0)[None]

    # Fast path: block lies entirely inside the valid data -> zero mask work.
    if full_blocks > 0:
        @pl.when(blk < full_blocks)
        def _():
            p = sigmoid(p_ref[...].astype(jnp.float32))
            t = t_ref[...].astype(jnp.float32)
            accumulate(p, t)

    # Tail path: the (at most one) partially-valid block.  Masks zero-padding and any
    # unspecified data in the BlockSpec-padded region past the array end.  Row/lane
    # granular compare -> no int32 overflow even for enormous n.
    if full_blocks < num_blocks:
        @pl.when((blk >= full_blocks) & (blk < num_blocks))
        def _():
            gr = blk * block_rows + jax.lax.broadcasted_iota(
                jnp.int32, (block_rows, LANES), 0)
            mask = gr < full_valid_rows
            if rem_lanes:
                lane = jax.lax.broadcasted_iota(jnp.int32, (block_rows, LANES), 1)
                mask = mask | ((gr == full_valid_rows) & (lane < rem_lanes))
            p = jnp.where(mask, sigmoid(p_ref[...].astype(jnp.float32)), 0.0)
            t = jnp.where(mask, t_ref[...].astype(jnp.float32), 0.0)
            accumulate(p, t)
    # Shard-overrun blocks (blk >= num_blocks; their DMA index is clamped to a valid
    # block by the index_map) fall through both pl.when's and contribute nothing.


def dice_loss(preds, targets, smooth=1e-6, *, max_block_rows=MAX_BLOCK_ROWS):
    """Pallas implementation of DiceLoss.forward (returns a scalar)."""
    n = preds.size
    p = preds.reshape(-1)
    t = targets.reshape(-1)

    # Row-major flatten (same order as torch .view(-1)).  Pad with zeros only so the
    # (rows, 128) reshape with rows % 32 == 0 is possible; padded elements are masked
    # inside the single tail block, so they never contribute.
    tile = ROW_ALIGN * LANES
    pad = (-n) % tile
    if pad:
        p = jnp.pad(p, (0, pad))
        t = jnp.pad(t, (0, pad))
    rows = (n + pad) // LANES                      # multiple of 32
    p2 = p.reshape(rows, LANES)
    t2 = t.reshape(rows, LANES)

    # Block size: as big as reasonable (amortises the ~0.35 us per-grid-step cost), but
    # capped at ~rows/2 so mid-sized inputs still produce >=2 blocks and the leading
    # "parallel" shard axis can feed both v7x TensorCores.
    if rows >= 2 * ROW_ALIGN:
        block_rows = min(max_block_rows, _round_up(rows // 2, ROW_ALIGN))
    else:
        block_rows = rows
    num_blocks = pl.cdiv(rows, block_rows)
    num_shards = 2 if num_blocks >= 2 else 1       # 2 TensorCores on v7x; serial elsewhere
    blocks_per_shard = pl.cdiv(num_blocks, num_shards)

    def in_index_map(c, i):
        # Clamp so every DMA targets a valid block; logically out-of-range blocks
        # (shard overrun when num_blocks is odd) are skipped inside the kernel.
        return (jnp.minimum(c * blocks_per_shard + i, num_blocks - 1), 0)

    out_spec = pl.BlockSpec((1, SUBLANES, LANES), lambda c, i: (c, 0, 0))
    acc_shape = jax.ShapeDtypeStruct((num_shards, SUBLANES, LANES), jnp.float32)

    kernel = functools.partial(
        _dice_sums_kernel, n_valid=n, block_rows=block_rows,
        blocks_per_shard=blocks_per_shard, num_blocks=num_blocks)

    # Double-buffered input blocks + generous headroom for internal scratch.  At the max
    # block size this is ~32 MiB: within physical VMEM on v5e/v6e (128 MiB) and v7x (64 MiB).
    in_block_bytes = block_rows * LANES * (p2.dtype.itemsize + t2.dtype.itemsize)
    vmem_limit = int(2 * in_block_bytes + (16 << 20))

    inter_parts, total_parts = pl.pallas_call(
        kernel,
        out_shape=(acc_shape, acc_shape),
        grid_spec=pltpu.PrefetchScalarGridSpec(
            num_scalar_prefetch=0,
            grid=(num_shards, blocks_per_shard),
            in_specs=[
                pl.BlockSpec((block_rows, LANES), in_index_map),
                pl.BlockSpec((block_rows, LANES), in_index_map),
            ],
            out_specs=[out_spec, out_spec],
        ),
        compiler_params=pltpu.CompilerParams(
            dimension_semantics=("parallel", "arbitrary"),
            vmem_limit_bytes=vmem_limit),
    )(p2, t2)

    # Final (num_shards, 8, 128) -> scalar reduction + dice formula is negligible glue.
    intersection = jnp.sum(inter_parts)
    p_plus_t = jnp.sum(total_parts)
    dice = (2.0 * intersection + smooth) / (p_plus_t + smooth)
    return 1.0 - dice


def _reference(preds, targets, smooth=1e-6):
    p = jax.nn.sigmoid(preds).reshape(-1)
    t = targets.reshape(-1)
    inter = jnp.sum(p * t)
    return 1.0 - (2.0 * inter + smooth) / (jnp.sum(p) + jnp.sum(t) + smooth)


if __name__ == "__main__":
    key = jax.random.PRNGKey(0)

    cases = [
        ((2, 4, 16, 16), {}),                          # primary shape: single padded block
        ((2, 3, 17, 19), {}),                          # n=1938: ragged lane tail, one block
        ((1, 2, 384, 384), {}),                        # two full blocks, 2 shards, pure fast path
        ((1, 1, 137, 135), {}),                        # BlockSpec-OOB garbage rows + lane tail
        ((1, 1, 137, 135), dict(max_block_rows=32)),   # multi-block shards + clamped overrun skip
    ]

    for idx, (shape, kwargs) in enumerate(cases):
        k1, k2 = jax.random.split(jax.random.fold_in(key, idx))
        preds = jax.random.normal(k1, shape, dtype=jnp.float32)              # logits
        targets = (jax.random.uniform(k2, shape) > 0.5).astype(jnp.float32)  # binary mask

        loss = jax.block_until_ready(dice_loss(preds, targets, **kwargs))
        ref = _reference(preds, targets)
        assert jnp.allclose(loss, ref, rtol=1e-5, atol=1e-5), (shape, kwargs, loss, ref)

    print("KERNEL_OK")
</pallas_src>

<mosaic_0001>
module attributes {stable_mosaic.version = 11 : i64} {
  func.func @_dice_sums_kernel(%arg0: i32, %arg1: i32, %arg2: memref<32x128xf32, #tpu.memory_space<vmem>>, %arg3: memref<32x128xf32, #tpu.memory_space<vmem>>, %arg4: memref<1x8x128xf32, #tpu.memory_space<vmem>>, %arg5: memref<1x8x128xf32, #tpu.memory_space<vmem>>) attributes {dimension_semantics = [#tpu.dimension_semantics<parallel>, #tpu.dimension_semantics<arbitrary>], iteration_bounds = array<i64: 1, 1>, scalar_prefetch = 0 : i64, scratch_operands = 0 : i64, tpu.core_type = #tpu.core_type<tc>, window_params = [{transform_indices = @transform_0, window_bounds = array<i64: 32, 128>}, {transform_indices = @transform_1, window_bounds = array<i64: 32, 128>}, {transform_indices = @transform_2, window_bounds = array<i64: 1, 8, 128>}, {transform_indices = @transform_3, window_bounds = array<i64: 1, 8, 128>}]} {
    %c0_i32 = arith.constant 0 : i32
    %0 = arith.cmpi eq, %arg1, %c0_i32 : i32
    %1 = arith.extui %0 : i1 to i32
    %c0_i32_0 = arith.constant 0 : i32
    %2 = arith.cmpi ne, %1, %c0_i32_0 : i32
    scf.if %2 {
      %cst = arith.constant 0.000000e+00 : f32
      %10 = vector.broadcast %cst : f32 to vector<1x8x128xf32>
      %c0 = arith.constant 0 : index
      %c0_4 = arith.constant 0 : index
      %c0_5 = arith.constant 0 : index
      %11 = vector.load %arg4[%c0, %c0_4, %c0_5] : memref<1x8x128xf32, #tpu.memory_space<vmem>>, vector<1x8x128xf32>
      tpu.vector_store %arg4[%c0, %c0_4, %c0_5], %10 {strides = array<i32>} : memref<1x8x128xf32, #tpu.memory_space<vmem>>, vector<1x8x128xf32>,
      %cst_6 = arith.constant 0.000000e+00 : f32
      %12 = vector.broadcast %cst_6 : f32 to vector<1x8x128xf32>
      %c0_7 = arith.constant 0 : index
      %c0_8 = arith.constant 0 : index
      %c0_9 = arith.constant 0 : index
      %13 = vector.load %arg5[%c0_7, %c0_8, %c0_9] : memref<1x8x128xf32, #tpu.memory_space<vmem>>, vector<1x8x128xf32>
      tpu.vector_store %arg5[%c0_7, %c0_8, %c0_9], %12 {strides = array<i32>} : memref<1x8x128xf32, #tpu.memory_space<vmem>>, vector<1x8x128xf32>,
    } else {
    }
    %c1_i32 = arith.constant 1 : i32
    %3 = arith.muli %arg0, %c1_i32 : i32
    %4 = arith.addi %3, %arg1 : i32
    %c0_i32_1 = arith.constant 0 : i32
    %5 = arith.cmpi sge, %4, %c0_i32_1 : i32
    %c1_i32_2 = arith.constant 1 : i32
    %6 = arith.cmpi slt, %4, %c1_i32_2 : i32
    %7 = arith.andi %5, %6 : i1
    %8 = arith.extui %7 : i1 to i32
    %c0_i32_3 = arith.constant 0 : i32
    %9 = arith.cmpi ne, %8, %c0_i32_3 : i32
    scf.if %9 {
      %c32_i32 = arith.constant 32 : i32
      %10 = arith.muli %4, %c32_i32 : i32
      %11 = tpu.iota {dimensions = array<i32: 0>} : vector<32x128xi32>
      %12 = vector.broadcast %10 : i32 to vector<32x128xi32>
      %13 = arith.addi %12, %11 : vector<32x128xi32>
      %c16_i32 = arith.constant 16 : i32
      %14 = vector.broadcast %c16_i32 : i32 to vector<32x128xi32>
      %15 = arith.cmpi slt, %13, %14 : vector<32x128xi32>
      %c0 = arith.constant 0 : index
      %c0_4 = arith.constant 0 : index
      %16 = vector.load %arg2[%c0, %c0_4] : memref<32x128xf32, #tpu.memory_space<vmem>>, vector<32x128xf32>
      %cst = arith.constant 5.000000e-01 : f32
      %17 = vector.broadcast %cst : f32 to vector<32x128xf32>
      %18 = arith.mulf %17, %16 : vector<32x128xf32>
      %19 = math.tanh %18 : vector<32x128xf32>
      %cst_5 = arith.constant 5.000000e-01 : f32
      %20 = vector.broadcast %cst_5 : f32 to vector<32x128xf32>
      %21 = arith.mulf %20, %19 : vector<32x128xf32>
      %cst_6 = arith.constant 5.000000e-01 : f32
      %22 = vector.broadcast %cst_6 : f32 to vector<32x128xf32>
      %23 = arith.addf %21, %22 : vector<32x128xf32>
      %cst_7 = arith.constant 0.000000e+00 : f32
      %24 = vector.broadcast %cst_7 : f32 to vector<32x128xf32>
      %25 = arith.select %15, %23, %24 : vector<32x128xi1>, vector<32x128xf32>
      %c0_8 = arith.constant 0 : index
      %c0_9 = arith.constant 0 : index
      %26 = vector.load %arg3[%c0_8, %c0_9] : memref<32x128xf32, #tpu.memory_space<vmem>>, vector<32x128xf32>
      %cst_10 = arith.constant 0.000000e+00 : f32
      %27 = vector.broadcast %cst_10 : f32 to vector<32x128xf32>
      %28 = arith.select %15, %26, %27 : vector<32x128xi1>, vector<32x128xf32>
      %c0_11 = arith.constant 0 : index
      %c0_12 = arith.constant 0 : index
      %c0_13 = arith.constant 0 : index
      %29 = vector.load %arg4[%c0_11, %c0_12, %c0_13] : memref<1x8x128xf32, #tpu.memory_space<vmem>>, vector<1x8x128xf32>
      %30 = arith.mulf %25, %28 : vector<32x128xf32>
      %31 = vector.shape_cast %30 : vector<32x128xf32> to vector<4x8x128xf32>
      %cst_14 = arith.constant dense<0.000000e+00> : vector<8x128xf32>
      %32 = vector.multi_reduction <add>, %31, %cst_14 [0] : vector<4x8x128xf32> to vector<8x128xf32>
      %33 = vector.shape_cast %32 : vector<8x128xf32> to vector<1x8x128xf32>
      %34 = arith.addf %29, %33 : vector<1x8x128xf32>
      %c0_15 = arith.constant 0 : index
      %c0_16 = arith.constant 0 : index
      %c0_17 = arith.constant 0 : index
      %35 = vector.load %arg4[%c0_15, %c0_16, %c0_17] : memref<1x8x128xf32, #tpu.memory_space<vmem>>, vector<1x8x128xf32>
      tpu.vector_store %arg4[%c0_15, %c0_16, %c0_17], %34 {strides = array<i32>} : memref<1x8x128xf32, #tpu.memory_space<vmem>>, vector<1x8x128xf32>,
      %c0_18 = arith.constant 0 : index
      %c0_19 = arith.constant 0 : index
      %c0_20 = arith.constant 0 : index
      %36 = vector.load %arg5[%c0_18, %c0_19, %c0_20] : memref<1x8x128xf32, #tpu.memory_space<vmem>>, vector<1x8x128xf32>
      %37 = arith.addf %25, %28 : vector<32x128xf32>
      %38 = vector.shape_cast %37 : vector<32x128xf32> to vector<4x8x128xf32>
      %cst_21 = arith.constant dense<0.000000e+00> : vector<8x128xf32>
      %39 = vector.multi_reduction <add>, %38, %cst_21 [0] : vector<4x8x128xf32> to vector<8x128xf32>
      %40 = vector.shape_cast %39 : vector<8x128xf32> to vector<1x8x128xf32>
      %41 = arith.addf %36, %40 : vector<1x8x128xf32>
      %c0_22 = arith.constant 0 : index
      %c0_23 = arith.constant 0 : index
      %c0_24 = arith.constant 0 : index
      %42 = vector.load %arg5[%c0_22, %c0_23, %c0_24] : memref<1x8x128xf32, #tpu.memory_space<vmem>>, vector<1x8x128xf32>
      tpu.vector_store %arg5[%c0_22, %c0_23, %c0_24], %41 {strides = array<i32>} : memref<1x8x128xf32, #tpu.memory_space<vmem>>, vector<1x8x128xf32>,
    } else {
    }
    return
  }
  func.func @transform_0(%arg0: i32, %arg1: i32) -> (i32, i32) {
    %c1_i32 = arith.constant 1 : i32
    %0 = arith.muli %arg0, %c1_i32 : i32
    %1 = arith.addi %0, %arg1 : i32
    %c0_i32 = arith.constant 0 : i32
    %2 = arith.minsi %1, %c0_i32 : i32
    %c0_i32_0 = arith.constant 0 : i32
    %c0_i32_1 = arith.constant 0 : i32
    return %2, %c0_i32_0 : i32, i32
  }
  func.func @transform_1(%arg0: i32, %arg1: i32) -> (i32, i32) {
    %c1_i32 = arith.constant 1 : i32
    %0 = arith.muli %arg0, %c1_i32 : i32
    %1 = arith.addi %0, %arg1 : i32
    %c0_i32 = arith.constant 0 : i32
    %2 = arith.minsi %1, %c0_i32 : i32
    %c0_i32_0 = arith.constant 0 : i32
    %c0_i32_1 = arith.constant 0 : i32
    return %2, %c0_i32_0 : i32, i32
  }
  func.func @transform_2(%arg0: i32, %arg1: i32) -> (i32, i32, i32) {
    %c0_i32 = arith.constant 0 : i32
    %c0_i32_0 = arith.constant 0 : i32
    %c0_i32_1 = arith.constant 0 : i32
    return %arg0, %c0_i32, %c0_i32_0 : i32, i32, i32
  }
  func.func @transform_3(%arg0: i32, %arg1: i32) -> (i32, i32, i32) {
    %c0_i32 = arith.constant 0 : i32
    %c0_i32_0 = arith.constant 0 : i32
    %c0_i32_1 = arith.constant 0 : i32
    return %arg0, %c0_i32, %c0_i32_0 : i32, i32, i32
  }
}

</mosaic_0001>

<bundles_post_ra>
// kernel: tpu_custom_call.1
= control target key start
LH: loop header
LB: loop body
LE: loop exit
PB: predicated region body
PF: predicated region fallthrough
CT: control target
= control target key end

     0   :  { %9 = vsyncpa [#allocation3], 0  ;;  %s358_s0 = inlined_call_operand.hbm [shape: f32[32,128], index: 0, kind: input, shape index: {}]   ;;  %s359_s1 = inlined_call_operand.hbm [shape: f32[32,128], index: 1, kind: input, shape index: {}]   ;;  %s360_s2 = inlined_call_operand.hbm [shape: f32[1,8,128], index: 2, kind: output, shape index: {0}]   ;;  %s361_s3 = inlined_call_operand.hbm [shape: f32[1,8,128], index: 3, kind: output, shape index: {1}]  }
   0x1   :  { %10 = vsyncpa [#allocation6], 0 }
   0x2   :  { %11 = vsyncpa [#allocation4], 0 }
   0x3   :  { %12 = vsyncpa [#allocation9], 0  ;;  %s284_s12 = smov [#allocation2]   ;;  %s188_s16 = scalar_lea.hbm %s358_s0, 512 }
   0x4   :  { %s24_s13 = sshll.u32 %s284_s12, 4  ;;  %p189_p0 = scmp.ne.s32.totalorder %s358_s0, %s188_s16  ;;  %s25_s13 = int_to_ptr.vmem [resolvable:$true] %s24_s13 }
   0x5   :  { %p192_p1 = scmp.lt.u32.totalorder %s188_s16, %s358_s0 }
   0x7   :  { %p194_p2 = pnand %p192_p1, %p189_p0 }
   0x9   :  { %197 = shalt.err (!%p194_p2)
}
   0xa   :  { %s198_s21 = scalar_lea.vmem %s25_s13, 512  ;;  %p203_p4 = scmp.lt.s32.totalorder %s25_s13, %s25_s13 }
   0xb   :  { %p199_p3 = scmp.ne.s32.totalorder %s25_s13, %s198_s21  ;;  %p204_p5 = scmp.lt.s32.totalorder %s198_s21, %s198_s21 }
   0xd   :  { %p205_p6 = por %p204_p5, %p203_p4 }
   0xf   :  { %p206_p7 = pnand %p205_p6, %p199_p3 }
  0x11   :  { %209 = shalt.err (!%p206_p7)
}
  0x12   :  { %s285_s22 = smov 128   ;;  %s286_s23 = smov 8  }
  0x13   :  { %30 = dma.hbm_to_vmem [thread:$0]  %s358_s0, 512, %s25_s13, [#allocation3], %s285_s22, %s285_s22, %s286_s23  }
  0x14   :  { %s287_s26 = smov [#allocation5]   ;;  %s210_s30 = scalar_lea.hbm %s359_s1, 512 }
  0x15   :  { %s42_s27 = sshll.u32 %s287_s26, 4  ;;  %p211_p8 = scmp.ne.s32.totalorder %s359_s1, %s210_s30  ;;  %s43_s27 = int_to_ptr.vmem [resolvable:$true] %s42_s27 }
  0x16   :  { %p214_p9 = scmp.lt.u32.totalorder %s210_s30, %s359_s1 }
  0x18   :  { %p216_p10 = pnand %p214_p9, %p211_p8 }
  0x1a   :  { %219 = shalt.err (!%p216_p10)
}
  0x1b   :  { %s220_s8 = scalar_lea.vmem %s43_s27, 512  ;;  %p225_p12 = scmp.lt.s32.totalorder %s43_s27, %s43_s27 }
  0x1c   :  { %p221_p11 = scmp.ne.s32.totalorder %s43_s27, %s220_s8  ;;  %p226_p13 = scmp.lt.s32.totalorder %s220_s8, %s220_s8 }
  0x1e   :  { %p227_p0 = por %p226_p13, %p225_p12 }
  0x20   :  { %p228_p1 = pnand %p227_p0, %p221_p11 }
  0x22   :  { %231 = shalt.err (!%p228_p1)
}
  0x23   :  { %48 = dma.hbm_to_vmem [thread:$0]  %s359_s1, 512, %s43_s27, [#allocation6], %s285_s22, %s285_s22, %s286_s23  }
  0x24   :  { %276 = dma.done.wait [#allocation3], 512  }
  0x25   :  { %277 = vsyncadd [#allocation3], 4294966784 }
  0x26   :  { %278 = dma.done.wait [#allocation6], 512  }
  0x27   :  { %279 = vsyncadd [#allocation6], 4294966784  ;;  %v91_v0 = vld [vmem:[#allocation2] sm:$0xff]  ;;  %v92_v1 = vld [vmem:[#allocation2 + $0x8] sm:$0xff]  ;;  %s288_s1 = smov [#allocation7]   ;;  %s289_s11 = smov [#allocation8]  }
  0x28   :  { %v95_v2 = vmul.f32 0.5, %v91_v0  ;;  %v96_v3 = vmul.f32 0.5, %v92_v1  ;;  %v115_v8 = vld [vmem:[#allocation5] sm:$0xff]  ;;  %v116_v10 = vld [vmem:[#allocation5 + $0x8] sm:$0xff]  ;;  %s149_s10 = sshll.u32 %s288_s1, 4  ;;  %s159_s12 = sshll.u32 %s289_s11, 4  ;;  %s150_s10 = int_to_ptr.vmem [resolvable:$true] %s149_s10  ;;  %s160_s12 = int_to_ptr.vmem [resolvable:$true] %s159_s12 }
  0x29   :  { %s232_s13 = scalar_lea.vmem %s150_s10, 128  ;;  %p237_p3 = scmp.lt.s32.totalorder %s150_s10, %s150_s10 }
  0x2a   :  { %184 = vtanh.f32 %v95_v2  ;;  %p233_p2 = scmp.ne.s32.totalorder %s150_s10, %s232_s13  ;;  %p238_p4 = scmp.lt.s32.totalorder %s232_s13, %s232_s13 }
  0x2b   :  { %186 = vtanh.f32 %v96_v3 }
  0x2c   :  { %p239_p5 = por %p238_p4, %p237_p3 }
  0x2e   :  { %p240_p6 = pnand %p239_p5, %p233_p2 }
  0x34   :  { %v185_v4 = vpop.eup %184 }
  0x35   :  { %v187_v5 = vpop.eup %186  ;;  %v103_v6 = vmul.f32 0.5, %v185_v4 }
  0x36   :  { %v104_v7 = vmul.f32 0.5, %v187_v5 }
  0x37   :  { %v107_v9 = vadd.f32 0.5, %v103_v6 }
  0x38   :  { %v108_v11 = vadd.f32 0.5, %v104_v7 }
  0x39   :  { %v124_v12 = vmul.f32 %v115_v8, %v107_v9  ;;  %v134_v13 = vadd.f32 %v115_v8, %v107_v9 }
  0x3a   :  { %v125_v14 = vmul.f32 %v116_v10, %v108_v11  ;;  %v135_v15 = vadd.f32 %v116_v10, %v108_v11 }
  0x3c   :  { %v128_v16 = vadd.f32 %v125_v14, %v124_v12  ;;  %v138_v17 = vadd.f32 %v135_v15, %v134_v13 }
  0x3e   :  { %132 = vst [vmem:[#allocation7] sm:$0xff] %v128_v16  ;;  %142 = vst [vmem:[#allocation8] sm:$0xff] %v138_v17 }
  0x3f   :  { %243 = shalt.err (!%p240_p6)
}
  0x40   :  { %s244_s16 = scalar_lea.hbm %s360_s2, 128 }
  0x41   :  { %p245_p7 = scmp.ne.s32.totalorder %s360_s2, %s244_s16  ;;  %p248_p8 = scmp.lt.u32.totalorder %s244_s16, %s360_s2 }
  0x43   :  { %p250_p9 = pnand %p248_p8, %p245_p7 }
  0x45   :  { %253 = shalt.err (!%p250_p9)
}
  0x46   :  { %152 = dma.vmem_to_hbm [thread:$0]  %s150_s10, 128, %s360_s2, [#allocation4]  }
  0x47   :  { %s254_s23 = scalar_lea.vmem %s160_s12, 128  ;;  %p259_p11 = scmp.lt.s32.totalorder %s160_s12, %s160_s12 }
  0x48   :  { %p255_p10 = scmp.ne.s32.totalorder %s160_s12, %s254_s23  ;;  %p260_p12 = scmp.lt.s32.totalorder %s254_s23, %s254_s23 }
  0x4a   :  { %p261_p13 = por %p260_p12, %p259_p11 }
  0x4c   :  { %p262_p0 = pnand %p261_p13, %p255_p10 }
  0x4e   :  { %265 = shalt.err (!%p262_p0)
}
  0x4f   :  { %s266_s26 = scalar_lea.hbm %s361_s3, 128 }
  0x50   :  { %p267_p1 = scmp.ne.s32.totalorder %s361_s3, %s266_s26  ;;  %p270_p2 = scmp.lt.u32.totalorder %s266_s26, %s361_s3 }
  0x52   :  { %p272_p3 = pnand %p270_p2, %p267_p1 }
  0x54   :  { %275 = shalt.err (!%p272_p3)
}
  0x55   :  { %162 = dma.vmem_to_hbm [thread:$0]  %s160_s12, 128, %s361_s3, [#allocation9]  }
  0x56   :  { %280 = dma.done.wait [#allocation4], 128  }
  0x57   :  { %281 = vsyncadd [#allocation4], 4294967168 }
  0x58   :  { %282 = dma.done.wait [#allocation9], 128  }
  0x59   :  { %283 = vsyncadd [#allocation9], 4294967168 }
  0x5a   :  { %169 = vsyncpa [#allocation3], 1 }
  0x5b   :  { %170 = vsyncpa [#allocation6], 1 }
  0x5c   :  { %171 = vsyncpa [#allocation4], 1 }
  0x5d   :  { %172 = vsyncpa [#allocation9], 1 }

</bundles_post_ra>
